<compile_context>
chip_gen: v7x
topology: tpu7x:2x2x1
jax: 0.10.0
libtpu: 0.0.40
codegen_flags: <defaults>
</compile_context>

<pallas_src>
import jax
import jax.numpy as jnp
from jax.experimental import pallas as pl
from jax.experimental.pallas import tpu as pltpu

IN_OUT = 100        # true input/output feature width (streamed as-is)
HID = 64            # padded lane width for interior layers (max true dim = 64)
N_SMALL = 9         # interior layers (1..4, composed 5+6, 7..10)
MAX_BLOCK_B = 2048  # max batch rows per grid step
MIN_BLOCK_B = 8     # sublane granularity for batch tiles

# PyTorch layer sizes: (in_features, out_features) per nn.Linear, in order.
LAYER_DIMS = [
    (100, 64), (64, 32), (32, 16), (16, 8), (8, 3), (3, 1),   # encoder
    (1, 3), (3, 8), (8, 16), (16, 32), (32, 64), (64, 100),   # decoder
]
# Activation after each layer: 'relu', 'none' (encoder output), or 'sigmoid'.
ACTIVATIONS = ["relu"] * 5 + ["none"] + ["relu"] * 5 + ["sigmoid"]


def _cdiv(a, b):
    return -(-a // b)


def _round_up(n, m):
    return ((n + m - 1) // m) * m


def _choose_tiling(batch):
    """Balanced batch tiling: (TB rows per grid step, number of grid steps)."""
    n_blocks = _cdiv(batch, MAX_BLOCK_B)
    # Give both TensorCores work on v7x (2 TC/chip) when the batch allows it,
    # and keep the block count even so the 2-way split is balanced.
    if batch >= 2 * MIN_BLOCK_B:
        n_blocks = max(n_blocks, 2)
        if n_blocks % 2:
            n_blocks += 1
    tb = _round_up(_cdiv(batch, n_blocks), MIN_BLOCK_B)
    if tb >= batch:
        tb = batch          # single full-array block (always a legal BlockSpec)
    return tb, _cdiv(batch, tb)


def autoencoder_kernel(x_ref, wf_ref, bf_ref, ws_ref, bs_ref, wl_ref, bl_ref, o_ref):
    """One batch tile of the full forward pass (11 fused matmuls).

    x_ref : (TB, 100) f32   input tile (last block may be ragged; masked store)
    wf_ref: (100, 64) bf16  layer 0 weight
    bf_ref: (1, 64)   f32   layer 0 bias
    ws_ref: (9, 64, 64) bf16 interior weights (layers 1..4, 5+6 composed, 7..10)
    bs_ref: (9, 1, 64)  f32  interior biases
    wl_ref: (64, 100) bf16  layer 11 weight
    bl_ref: (1, 100)  f32   layer 11 bias
    o_ref : (TB, 100) f32   output tile
    """
    h = x_ref[...]                                            # (TB, 100) f32

    # Layer 0: 100 -> 64, ReLU
    h = jnp.dot(h.astype(jnp.bfloat16), wf_ref[...],
                preferred_element_type=jnp.float32) + bf_ref[...]
    h = jnp.maximum(h, 0.0)

    # Interior layers packed into the 64x64 slab; every one is followed by ReLU
    # (the activation-free 3->1->3 bottleneck was composed away at init time).
    for i in range(N_SMALL):
        h = jnp.dot(h.astype(jnp.bfloat16), ws_ref[i],
                    preferred_element_type=jnp.float32) + bs_ref[i]
        h = jnp.maximum(h, 0.0)

    # Layer 11: 64 -> 100, Sigmoid
    h = jnp.dot(h.astype(jnp.bfloat16), wl_ref[...],
                preferred_element_type=jnp.float32) + bl_ref[...]
    o_ref[...] = jax.nn.sigmoid(h)


def init_params(key):
    """Init mimicking PyTorch nn.Linear default U(-1/sqrt(fan_in), +).

    Returns (packed, (raw_ws, raw_bs)):
      packed = kernel-ready weights (bf16, layers 5/6 composed, interior slab
               zero-padded to 64x64) and f32 biases.
      raw    = unpadded f32 weights/biases for the PyTorch-semantics reference.
    """
    raw_ws, raw_bs = [], []
    for (fan_in, fan_out) in LAYER_DIMS:
        key, kw, kb = jax.random.split(key, 3)
        bound = float(fan_in) ** -0.5
        w = jax.random.uniform(kw, (fan_in, fan_out), jnp.float32, -bound, bound)
        b = jax.random.uniform(kb, (fan_out,), jnp.float32, -bound, bound)
        raw_ws.append(w)
        raw_bs.append(b)

    # Exact composition of layer 5 (3->1, no activation) with layer 6 (1->3).
    w56 = raw_ws[5] @ raw_ws[6]                    # (3, 3)
    b56 = raw_bs[5] @ raw_ws[6] + raw_bs[6]        # (3,)

    interior = ([(raw_ws[l], raw_bs[l]) for l in range(1, 5)]
                + [(w56, b56)]
                + [(raw_ws[l], raw_bs[l]) for l in range(7, 11)])
    assert len(interior) == N_SMALL

    # Layer 0 / layer 11 kept at their natural shapes (no lane padding needed).
    w_first = raw_ws[0].astype(jnp.bfloat16)       # (100, 64)
    b_first = raw_bs[0].reshape(1, -1)             # (1, 64) f32
    w_last = raw_ws[11].astype(jnp.bfloat16)       # (64, 100)
    b_last = raw_bs[11].reshape(1, -1)             # (1, 100) f32

    # Interior slab: zero-padded to (9, 64, 64) bf16 / (9, 1, 64) f32.
    w_small = jnp.zeros((N_SMALL, HID, HID), jnp.bfloat16)
    b_small = jnp.zeros((N_SMALL, 1, HID), jnp.float32)
    for idx, (w, b) in enumerate(interior):
        fi, fo = w.shape
        w_small = w_small.at[idx, :fi, :fo].set(w.astype(jnp.bfloat16))
        b_small = b_small.at[idx, 0, :fo].set(b)

    packed = (w_first, b_first, w_small, b_small, w_last, b_last)
    return packed, (raw_ws, raw_bs)


@jax.jit
def autoencoder_forward(x, packed):
    """x: (B, 100) float32 -> (B, 100) float32.  No wrapper pad/slice passes."""
    w_first, b_first, w_small, b_small, w_last, b_last = packed
    B, F = x.shape
    assert F == IN_OUT, f"expected {IN_OUT} input features, got {F}"

    TB, n_blocks = _choose_tiling(B)

    return pl.pallas_call(
        autoencoder_kernel,
        out_shape=jax.ShapeDtypeStruct((B, F), jnp.float32),
        grid=(n_blocks,),
        in_specs=[
            pl.BlockSpec((TB, F), lambda i: (i, 0)),                  # x tile
            pl.BlockSpec(w_first.shape, lambda i: (0, 0)),            # resident
            pl.BlockSpec(b_first.shape, lambda i: (0, 0)),
            pl.BlockSpec(w_small.shape, lambda i: (0, 0, 0)),         # resident
            pl.BlockSpec(b_small.shape, lambda i: (0, 0, 0)),
            pl.BlockSpec(w_last.shape, lambda i: (0, 0)),             # resident
            pl.BlockSpec(b_last.shape, lambda i: (0, 0)),
        ],
        out_specs=pl.BlockSpec((TB, F), lambda i: (i, 0)),
        compiler_params=pltpu.CompilerParams(
            dimension_semantics=("parallel",),
            vmem_limit_bytes=16 << 20,
        ),
    )(x, w_first, b_first, w_small, b_small, w_last, b_last)


def reference_from_packed(x, packed):
    """Plain-JAX replica of the kernel math (bf16 weights, f32 accumulate)."""
    w_first, b_first, w_small, b_small, w_last, b_last = packed
    h = jnp.dot(x.astype(jnp.bfloat16), w_first,
                preferred_element_type=jnp.float32) + b_first
    h = jnp.maximum(h, 0.0)
    for i in range(N_SMALL):
        h = jnp.dot(h.astype(jnp.bfloat16), w_small[i],
                    preferred_element_type=jnp.float32) + b_small[i]
        h = jnp.maximum(h, 0.0)
    h = jnp.dot(h.astype(jnp.bfloat16), w_last,
                preferred_element_type=jnp.float32) + b_last
    return jax.nn.sigmoid(h)


def reference_fp32(x, raw_ws, raw_bs):
    """Full-precision reference matching the PyTorch module semantics."""
    h = x
    for l in range(len(LAYER_DIMS)):
        h = h @ raw_ws[l] + raw_bs[l]
        if ACTIVATIONS[l] == "relu":
            h = jnp.maximum(h, 0.0)
        elif ACTIVATIONS[l] == "sigmoid":
            h = jax.nn.sigmoid(h)
    return h


if __name__ == "__main__":
    key = jax.random.PRNGKey(0)
    k_x, k_x2, k_p = jax.random.split(key, 3)

    packed, (raw_ws, raw_bs) = init_params(k_p)

    # Small batch: 2 blocks of 8 rows (both TCs would get work on v7x).
    batch = 16
    x = jax.random.uniform(k_x, (batch, 100), jnp.float32)
    out = jax.block_until_ready(autoencoder_forward(x, packed))
    assert out.shape == (batch, 100)
    assert jnp.allclose(out, reference_from_packed(x, packed), atol=1e-4, rtol=1e-4), \
        "mismatch vs packed (bf16-weight) JAX reference"
    assert jnp.allclose(out, reference_fp32(x, raw_ws, raw_bs), atol=3e-2, rtol=3e-2), \
        "mismatch vs f32 PyTorch-semantics reference"

    # Awkward batch: balanced tiles (312 + 300) with a ragged, masked last block.
    batch2 = 612
    x2 = jax.random.uniform(k_x2, (batch2, 100), jnp.float32)
    out2 = jax.block_until_ready(autoencoder_forward(x2, packed))
    assert out2.shape == (batch2, 100)
    assert jnp.allclose(out2, reference_from_packed(x2, packed), atol=1e-4, rtol=1e-4), \
        "mismatch vs packed (bf16-weight) JAX reference (large batch)"

    print("KERNEL_OK")
</pallas_src>

<mosaic_0001>
module attributes {stable_mosaic.version = 11 : i64} {
  func.func @autoencoder_kernel(%arg0: i32, %arg1: memref<8x100xf32, #tpu.memory_space<vmem>>, %arg2: memref<100x64xbf16, #tpu.memory_space<vmem>>, %arg3: memref<1x64xf32, #tpu.memory_space<vmem>>, %arg4: memref<9x64x64xbf16, #tpu.memory_space<vmem>>, %arg5: memref<9x1x64xf32, #tpu.memory_space<vmem>>, %arg6: memref<64x100xbf16, #tpu.memory_space<vmem>>, %arg7: memref<1x100xf32, #tpu.memory_space<vmem>>, %arg8: memref<8x100xf32, #tpu.memory_space<vmem>>) attributes {dimension_semantics = [#tpu.dimension_semantics<parallel>], iteration_bounds = array<i64: 2>, scalar_prefetch = 0 : i64, scratch_operands = 0 : i64, tpu.core_type = #tpu.core_type<tc>, window_params = [{transform_indices = @transform_0, window_bounds = array<i64: 8, 100>}, {pipeline_mode = #tpu.pipeline_mode<synchronous>, transform_indices = @transform_1, window_bounds = array<i64: 100, 64>}, {pipeline_mode = #tpu.pipeline_mode<synchronous>, transform_indices = @transform_2, window_bounds = array<i64: 1, 64>}, {pipeline_mode = #tpu.pipeline_mode<synchronous>, transform_indices = @transform_3, window_bounds = array<i64: 9, 64, 64>}, {pipeline_mode = #tpu.pipeline_mode<synchronous>, transform_indices = @transform_4, window_bounds = array<i64: 9, 1, 64>}, {pipeline_mode = #tpu.pipeline_mode<synchronous>, transform_indices = @transform_5, window_bounds = array<i64: 64, 100>}, {pipeline_mode = #tpu.pipeline_mode<synchronous>, transform_indices = @transform_6, window_bounds = array<i64: 1, 100>}, {transform_indices = @transform_7, window_bounds = array<i64: 8, 100>}]} {
    %c0 = arith.constant 0 : index
    %c0_0 = arith.constant 0 : index
    %0 = vector.load %arg1[%c0, %c0_0] : memref<8x100xf32, #tpu.memory_space<vmem>>, vector<8x100xf32>
    %1 = arith.truncf %0 : vector<8x100xf32> to vector<8x100xbf16>
    %c0_1 = arith.constant 0 : index
    %c0_2 = arith.constant 0 : index
    %2 = vector.load %arg2[%c0_1, %c0_2] : memref<100x64xbf16, #tpu.memory_space<vmem>>, vector<100x64xbf16>
    %cst = arith.constant dense<0.000000e+00> : vector<8x64xf32>
    %3 = tpu.matmul %1, %2, %cst {dimension_numbers = #tpu.dot_dimension_numbers<[1], [0], [0], [1], [0, 0, 1, 1], [], []>} : vector<8x100xbf16>, vector<100x64xbf16>, vector<8x64xf32> -> vector<8x64xf32>
    %c0_3 = arith.constant 0 : index
    %c0_4 = arith.constant 0 : index
    %4 = vector.load %arg3[%c0_3, %c0_4] : memref<1x64xf32, #tpu.memory_space<vmem>>, vector<1x64xf32>
    %5 = vector.broadcast %4 : vector<1x64xf32> to vector<8x64xf32>
    %6 = arith.addf %3, %5 : vector<8x64xf32>
    %cst_5 = arith.constant 0.000000e+00 : f32
    %7 = vector.broadcast %cst_5 : f32 to vector<8x64xf32>
    %8 = arith.maximumf %6, %7 : vector<8x64xf32>
    %9 = arith.truncf %8 : vector<8x64xf32> to vector<8x64xbf16>
    %c0_6 = arith.constant 0 : index
    %c0_7 = arith.constant 0 : index
    %c0_8 = arith.constant 0 : index
    %10 = vector.load %arg4[%c0_6, %c0_7, %c0_8] : memref<9x64x64xbf16, #tpu.memory_space<vmem>>, vector<1x64x64xbf16>
    %11 = vector.shape_cast %10 : vector<1x64x64xbf16> to vector<64x64xbf16>
    %cst_9 = arith.constant dense<0.000000e+00> : vector<8x64xf32>
    %12 = tpu.matmul %9, %11, %cst_9 {dimension_numbers = #tpu.dot_dimension_numbers<[1], [0], [0], [1], [0, 0, 1, 1], [], []>} : vector<8x64xbf16>, vector<64x64xbf16>, vector<8x64xf32> -> vector<8x64xf32>
    %c0_10 = arith.constant 0 : index
    %c0_11 = arith.constant 0 : index
    %c0_12 = arith.constant 0 : index
    %13 = vector.load %arg5[%c0_10, %c0_11, %c0_12] : memref<9x1x64xf32, #tpu.memory_space<vmem>>, vector<1x1x64xf32>
    %14 = vector.shape_cast %13 : vector<1x1x64xf32> to vector<1x64xf32>
    %15 = vector.broadcast %14 : vector<1x64xf32> to vector<8x64xf32>
    %16 = arith.addf %12, %15 : vector<8x64xf32>
    %cst_13 = arith.constant 0.000000e+00 : f32
    %17 = vector.broadcast %cst_13 : f32 to vector<8x64xf32>
    %18 = arith.maximumf %16, %17 : vector<8x64xf32>
    %19 = arith.truncf %18 : vector<8x64xf32> to vector<8x64xbf16>
    %c1 = arith.constant 1 : index
    %c0_14 = arith.constant 0 : index
    %c0_15 = arith.constant 0 : index
    %20 = vector.load %arg4[%c1, %c0_14, %c0_15] : memref<9x64x64xbf16, #tpu.memory_space<vmem>>, vector<1x64x64xbf16>
    %21 = vector.shape_cast %20 : vector<1x64x64xbf16> to vector<64x64xbf16>
    %cst_16 = arith.constant dense<0.000000e+00> : vector<8x64xf32>
    %22 = tpu.matmul %19, %21, %cst_16 {dimension_numbers = #tpu.dot_dimension_numbers<[1], [0], [0], [1], [0, 0, 1, 1], [], []>} : vector<8x64xbf16>, vector<64x64xbf16>, vector<8x64xf32> -> vector<8x64xf32>
    %c1_17 = arith.constant 1 : index
    %c0_18 = arith.constant 0 : index
    %c0_19 = arith.constant 0 : index
    %23 = vector.load %arg5[%c1_17, %c0_18, %c0_19] : memref<9x1x64xf32, #tpu.memory_space<vmem>>, vector<1x1x64xf32>
    %24 = vector.shape_cast %23 : vector<1x1x64xf32> to vector<1x64xf32>
    %25 = vector.broadcast %24 : vector<1x64xf32> to vector<8x64xf32>
    %26 = arith.addf %22, %25 : vector<8x64xf32>
    %cst_20 = arith.constant 0.000000e+00 : f32
    %27 = vector.broadcast %cst_20 : f32 to vector<8x64xf32>
    %28 = arith.maximumf %26, %27 : vector<8x64xf32>
    %29 = arith.truncf %28 : vector<8x64xf32> to vector<8x64xbf16>
    %c2 = arith.constant 2 : index
    %c0_21 = arith.constant 0 : index
    %c0_22 = arith.constant 0 : index
    %30 = vector.load %arg4[%c2, %c0_21, %c0_22] : memref<9x64x64xbf16, #tpu.memory_space<vmem>>, vector<1x64x64xbf16>
    %31 = vector.shape_cast %30 : vector<1x64x64xbf16> to vector<64x64xbf16>
    %cst_23 = arith.constant dense<0.000000e+00> : vector<8x64xf32>
    %32 = tpu.matmul %29, %31, %cst_23 {dimension_numbers = #tpu.dot_dimension_numbers<[1], [0], [0], [1], [0, 0, 1, 1], [], []>} : vector<8x64xbf16>, vector<64x64xbf16>, vector<8x64xf32> -> vector<8x64xf32>
    %c2_24 = arith.constant 2 : index
    %c0_25 = arith.constant 0 : index
    %c0_26 = arith.constant 0 : index
    %33 = vector.load %arg5[%c2_24, %c0_25, %c0_26] : memref<9x1x64xf32, #tpu.memory_space<vmem>>, vector<1x1x64xf32>
    %34 = vector.shape_cast %33 : vector<1x1x64xf32> to vector<1x64xf32>
    %35 = vector.broadcast %34 : vector<1x64xf32> to vector<8x64xf32>
    %36 = arith.addf %32, %35 : vector<8x64xf32>
    %cst_27 = arith.constant 0.000000e+00 : f32
    %37 = vector.broadcast %cst_27 : f32 to vector<8x64xf32>
    %38 = arith.maximumf %36, %37 : vector<8x64xf32>
    %39 = arith.truncf %38 : vector<8x64xf32> to vector<8x64xbf16>
    %c3 = arith.constant 3 : index
    %c0_28 = arith.constant 0 : index
    %c0_29 = arith.constant 0 : index
    %40 = vector.load %arg4[%c3, %c0_28, %c0_29] : memref<9x64x64xbf16, #tpu.memory_space<vmem>>, vector<1x64x64xbf16>
    %41 = vector.shape_cast %40 : vector<1x64x64xbf16> to vector<64x64xbf16>
    %cst_30 = arith.constant dense<0.000000e+00> : vector<8x64xf32>
    %42 = tpu.matmul %39, %41, %cst_30 {dimension_numbers = #tpu.dot_dimension_numbers<[1], [0], [0], [1], [0, 0, 1, 1], [], []>} : vector<8x64xbf16>, vector<64x64xbf16>, vector<8x64xf32> -> vector<8x64xf32>
    %c3_31 = arith.constant 3 : index
    %c0_32 = arith.constant 0 : index
    %c0_33 = arith.constant 0 : index
    %43 = vector.load %arg5[%c3_31, %c0_32, %c0_33] : memref<9x1x64xf32, #tpu.memory_space<vmem>>, vector<1x1x64xf32>
    %44 = vector.shape_cast %43 : vector<1x1x64xf32> to vector<1x64xf32>
    %45 = vector.broadcast %44 : vector<1x64xf32> to vector<8x64xf32>
    %46 = arith.addf %42, %45 : vector<8x64xf32>
    %cst_34 = arith.constant 0.000000e+00 : f32
    %47 = vector.broadcast %cst_34 : f32 to vector<8x64xf32>
    %48 = arith.maximumf %46, %47 : vector<8x64xf32>
    %49 = arith.truncf %48 : vector<8x64xf32> to vector<8x64xbf16>
    %c4 = arith.constant 4 : index
    %c0_35 = arith.constant 0 : index
    %c0_36 = arith.constant 0 : index
    %50 = vector.load %arg4[%c4, %c0_35, %c0_36] : memref<9x64x64xbf16, #tpu.memory_space<vmem>>, vector<1x64x64xbf16>
    %51 = vector.shape_cast %50 : vector<1x64x64xbf16> to vector<64x64xbf16>
    %cst_37 = arith.constant dense<0.000000e+00> : vector<8x64xf32>
    %52 = tpu.matmul %49, %51, %cst_37 {dimension_numbers = #tpu.dot_dimension_numbers<[1], [0], [0], [1], [0, 0, 1, 1], [], []>} : vector<8x64xbf16>, vector<64x64xbf16>, vector<8x64xf32> -> vector<8x64xf32>
    %c4_38 = arith.constant 4 : index
    %c0_39 = arith.constant 0 : index
    %c0_40 = arith.constant 0 : index
    %53 = vector.load %arg5[%c4_38, %c0_39, %c0_40] : memref<9x1x64xf32, #tpu.memory_space<vmem>>, vector<1x1x64xf32>
    %54 = vector.shape_cast %53 : vector<1x1x64xf32> to vector<1x64xf32>
    %55 = vector.broadcast %54 : vector<1x64xf32> to vector<8x64xf32>
    %56 = arith.addf %52, %55 : vector<8x64xf32>
    %cst_41 = arith.constant 0.000000e+00 : f32
    %57 = vector.broadcast %cst_41 : f32 to vector<8x64xf32>
    %58 = arith.maximumf %56, %57 : vector<8x64xf32>
    %59 = arith.truncf %58 : vector<8x64xf32> to vector<8x64xbf16>
    %c5 = arith.constant 5 : index
    %c0_42 = arith.constant 0 : index
    %c0_43 = arith.constant 0 : index
    %60 = vector.load %arg4[%c5, %c0_42, %c0_43] : memref<9x64x64xbf16, #tpu.memory_space<vmem>>, vector<1x64x64xbf16>
    %61 = vector.shape_cast %60 : vector<1x64x64xbf16> to vector<64x64xbf16>
    %cst_44 = arith.constant dense<0.000000e+00> : vector<8x64xf32>
    %62 = tpu.matmul %59, %61, %cst_44 {dimension_numbers = #tpu.dot_dimension_numbers<[1], [0], [0], [1], [0, 0, 1, 1], [], []>} : vector<8x64xbf16>, vector<64x64xbf16>, vector<8x64xf32> -> vector<8x64xf32>
    %c5_45 = arith.constant 5 : index
    %c0_46 = arith.constant 0 : index
    %c0_47 = arith.constant 0 : index
    %63 = vector.load %arg5[%c5_45, %c0_46, %c0_47] : memref<9x1x64xf32, #tpu.memory_space<vmem>>, vector<1x1x64xf32>
    %64 = vector.shape_cast %63 : vector<1x1x64xf32> to vector<1x64xf32>
    %65 = vector.broadcast %64 : vector<1x64xf32> to vector<8x64xf32>
    %66 = arith.addf %62, %65 : vector<8x64xf32>
    %cst_48 = arith.constant 0.000000e+00 : f32
    %67 = vector.broadcast %cst_48 : f32 to vector<8x64xf32>
    %68 = arith.maximumf %66, %67 : vector<8x64xf32>
    %69 = arith.truncf %68 : vector<8x64xf32> to vector<8x64xbf16>
    %c6 = arith.constant 6 : index
    %c0_49 = arith.constant 0 : index
    %c0_50 = arith.constant 0 : index
    %70 = vector.load %arg4[%c6, %c0_49, %c0_50] : memref<9x64x64xbf16, #tpu.memory_space<vmem>>, vector<1x64x64xbf16>
    %71 = vector.shape_cast %70 : vector<1x64x64xbf16> to vector<64x64xbf16>
    %cst_51 = arith.constant dense<0.000000e+00> : vector<8x64xf32>
    %72 = tpu.matmul %69, %71, %cst_51 {dimension_numbers = #tpu.dot_dimension_numbers<[1], [0], [0], [1], [0, 0, 1, 1], [], []>} : vector<8x64xbf16>, vector<64x64xbf16>, vector<8x64xf32> -> vector<8x64xf32>
    %c6_52 = arith.constant 6 : index
    %c0_53 = arith.constant 0 : index
    %c0_54 = arith.constant 0 : index
    %73 = vector.load %arg5[%c6_52, %c0_53, %c0_54] : memref<9x1x64xf32, #tpu.memory_space<vmem>>, vector<1x1x64xf32>
    %74 = vector.shape_cast %73 : vector<1x1x64xf32> to vector<1x64xf32>
    %75 = vector.broadcast %74 : vector<1x64xf32> to vector<8x64xf32>
    %76 = arith.addf %72, %75 : vector<8x64xf32>
    %cst_55 = arith.constant 0.000000e+00 : f32
    %77 = vector.broadcast %cst_55 : f32 to vector<8x64xf32>
    %78 = arith.maximumf %76, %77 : vector<8x64xf32>
    %79 = arith.truncf %78 : vector<8x64xf32> to vector<8x64xbf16>
    %c7 = arith.constant 7 : index
    %c0_56 = arith.constant 0 : index
    %c0_57 = arith.constant 0 : index
    %80 = vector.load %arg4[%c7, %c0_56, %c0_57] : memref<9x64x64xbf16, #tpu.memory_space<vmem>>, vector<1x64x64xbf16>
    %81 = vector.shape_cast %80 : vector<1x64x64xbf16> to vector<64x64xbf16>
    %cst_58 = arith.constant dense<0.000000e+00> : vector<8x64xf32>
    %82 = tpu.matmul %79, %81, %cst_58 {dimension_numbers = #tpu.dot_dimension_numbers<[1], [0], [0], [1], [0, 0, 1, 1], [], []>} : vector<8x64xbf16>, vector<64x64xbf16>, vector<8x64xf32> -> vector<8x64xf32>
    %c7_59 = arith.constant 7 : index
    %c0_60 = arith.constant 0 : index
    %c0_61 = arith.constant 0 : index
    %83 = vector.load %arg5[%c7_59, %c0_60, %c0_61] : memref<9x1x64xf32, #tpu.memory_space<vmem>>, vector<1x1x64xf32>
    %84 = vector.shape_cast %83 : vector<1x1x64xf32> to vector<1x64xf32>
    %85 = vector.broadcast %84 : vector<1x64xf32> to vector<8x64xf32>
    %86 = arith.addf %82, %85 : vector<8x64xf32>
    %cst_62 = arith.constant 0.000000e+00 : f32
    %87 = vector.broadcast %cst_62 : f32 to vector<8x64xf32>
    %88 = arith.maximumf %86, %87 : vector<8x64xf32>
    %89 = arith.truncf %88 : vector<8x64xf32> to vector<8x64xbf16>
    %c8 = arith.constant 8 : index
    %c0_63 = arith.constant 0 : index
    %c0_64 = arith.constant 0 : index
    %90 = vector.load %arg4[%c8, %c0_63, %c0_64] : memref<9x64x64xbf16, #tpu.memory_space<vmem>>, vector<1x64x64xbf16>
    %91 = vector.shape_cast %90 : vector<1x64x64xbf16> to vector<64x64xbf16>
    %cst_65 = arith.constant dense<0.000000e+00> : vector<8x64xf32>
    %92 = tpu.matmul %89, %91, %cst_65 {dimension_numbers = #tpu.dot_dimension_numbers<[1], [0], [0], [1], [0, 0, 1, 1], [], []>} : vector<8x64xbf16>, vector<64x64xbf16>, vector<8x64xf32> -> vector<8x64xf32>
    %c8_66 = arith.constant 8 : index
    %c0_67 = arith.constant 0 : index
    %c0_68 = arith.constant 0 : index
    %93 = vector.load %arg5[%c8_66, %c0_67, %c0_68] : memref<9x1x64xf32, #tpu.memory_space<vmem>>, vector<1x1x64xf32>
    %94 = vector.shape_cast %93 : vector<1x1x64xf32> to vector<1x64xf32>
    %95 = vector.broadcast %94 : vector<1x64xf32> to vector<8x64xf32>
    %96 = arith.addf %92, %95 : vector<8x64xf32>
    %cst_69 = arith.constant 0.000000e+00 : f32
    %97 = vector.broadcast %cst_69 : f32 to vector<8x64xf32>
    %98 = arith.maximumf %96, %97 : vector<8x64xf32>
    %99 = arith.truncf %98 : vector<8x64xf32> to vector<8x64xbf16>
    %c0_70 = arith.constant 0 : index
    %c0_71 = arith.constant 0 : index
    %100 = vector.load %arg6[%c0_70, %c0_71] : memref<64x100xbf16, #tpu.memory_space<vmem>>, vector<64x100xbf16>
    %cst_72 = arith.constant dense<0.000000e+00> : vector<8x100xf32>
    %101 = tpu.matmul %99, %100, %cst_72 {dimension_numbers = #tpu.dot_dimension_numbers<[1], [0], [0], [1], [0, 0, 1, 1], [], []>} : vector<8x64xbf16>, vector<64x100xbf16>, vector<8x100xf32> -> vector<8x100xf32>
    %c0_73 = arith.constant 0 : index
    %c0_74 = arith.constant 0 : index
    %102 = vector.load %arg7[%c0_73, %c0_74] : memref<1x100xf32, #tpu.memory_space<vmem>>, vector<1x100xf32>
    %103 = vector.broadcast %102 : vector<1x100xf32> to vector<8x100xf32>
    %104 = arith.addf %101, %103 : vector<8x100xf32>
    %105 = arith.negf %104 : vector<8x100xf32>
    %106 = math.exp %105 : vector<8x100xf32>
    %cst_75 = arith.constant 1.000000e+00 : f32
    %107 = vector.broadcast %cst_75 : f32 to vector<8x100xf32>
    %108 = arith.addf %107, %106 : vector<8x100xf32>
    %109 = arith.divf %107, %108 : vector<8x100xf32>
    %c0_76 = arith.constant 0 : index
    %c0_77 = arith.constant 0 : index
    %110 = vector.load %arg8[%c0_76, %c0_77] : memref<8x100xf32, #tpu.memory_space<vmem>>, vector<8x100xf32>
    tpu.vector_store %arg8[%c0_76, %c0_77], %109 {strides = array<i32>} : memref<8x100xf32, #tpu.memory_space<vmem>>, vector<8x100xf32>,
    return
  }
  func.func @transform_0(%arg0: i32) -> (i32, i32) {
    %c0_i32 = arith.constant 0 : i32
    %c0_i32_0 = arith.constant 0 : i32
    return %arg0, %c0_i32 : i32, i32
  }
  func.func @transform_1(%arg0: i32) -> (i32, i32) {
    %c0_i32 = arith.constant 0 : i32
    %c0_i32_0 = arith.constant 0 : i32
    %c0_i32_1 = arith.constant 0 : i32
    return %c0_i32, %c0_i32_0 : i32, i32
  }
  func.func @transform_2(%arg0: i32) -> (i32, i32) {
    %c0_i32 = arith.constant 0 : i32
    %c0_i32_0 = arith.constant 0 : i32
    %c0_i32_1 = arith.constant 0 : i32
    return %c0_i32, %c0_i32_0 : i32, i32
  }
  func.func @transform_3(%arg0: i32) -> (i32, i32, i32) {
    %c0_i32 = arith.constant 0 : i32
    %c0_i32_0 = arith.constant 0 : i32
    %c0_i32_1 = arith.constant 0 : i32
    %c0_i32_2 = arith.constant 0 : i32
    return %c0_i32, %c0_i32_0, %c0_i32_1 : i32, i32, i32
  }
  func.func @transform_4(%arg0: i32) -> (i32, i32, i32) {
    %c0_i32 = arith.constant 0 : i32
    %c0_i32_0 = arith.constant 0 : i32
    %c0_i32_1 = arith.constant 0 : i32
    %c0_i32_2 = arith.constant 0 : i32
    return %c0_i32, %c0_i32_0, %c0_i32_1 : i32, i32, i32
  }
  func.func @transform_5(%arg0: i32) -> (i32, i32) {
    %c0_i32 = arith.constant 0 : i32
    %c0_i32_0 = arith.constant 0 : i32
    %c0_i32_1 = arith.constant 0 : i32
    return %c0_i32, %c0_i32_0 : i32, i32
  }
  func.func @transform_6(%arg0: i32) -> (i32, i32) {
    %c0_i32 = arith.constant 0 : i32
    %c0_i32_0 = arith.constant 0 : i32
    %c0_i32_1 = arith.constant 0 : i32
    return %c0_i32, %c0_i32_0 : i32, i32
  }
  func.func @transform_7(%arg0: i32) -> (i32, i32) {
    %c0_i32 = arith.constant 0 : i32
    %c0_i32_0 = arith.constant 0 : i32
    return %arg0, %c0_i32 : i32, i32
  }
}

</mosaic_0001>

<bundles_post_ra>
// kernel: autoencoder_forward.1
= control target key start
LH: loop header
LB: loop body
LE: loop exit
PB: predicated region body
PF: predicated region fallthrough
CT: control target
= control target key end

     0   :  { %12 = vsyncpa [#allocation3], 0  ;;  %s2163_s0 = inlined_call_operand.vmem [shape: f32[16,100], index: 0, kind: input, shape index: {}]   ;;  %s2164_s1 = inlined_call_operand.vmem [shape: bf16[100,64], index: 1, kind: input, shape index: {}]   ;;  %s2165_s2 = inlined_call_operand.vmem [shape: f32[1,64], index: 2, kind: input, shape index: {}]   ;;  %s2166_s3 = inlined_call_operand.hbm [shape: bf16[9,64,64], index: 3, kind: input, shape index: {}]   ;;  %s2167_s4 = inlined_call_operand.vmem [shape: f32[9,1,64], index: 4, kind: input, shape index: {}]   ;;  %s2168_s5 = inlined_call_operand.vmem [shape: bf16[64,100], index: 5, kind: input, shape index: {}]   ;;  %s2169_s6 = inlined_call_operand.vmem [shape: f32[1,100], index: 6, kind: input, shape index: {}]   ;;  %s2170_s7 = inlined_call_operand.hbm [shape: f32[16,100], index: 7, kind: output, shape index: {}]  }
   0x1   :  { %13 = vsyncpa [#allocation4], 0 }
   0x2   :  { %15 = vsyncpa [#allocation4 + $0x1], 0  ;;  %s1881_s24 = smov 0   ;;  %s1883_s25 = smov 0  }
   0x3   :  { %s1885_s26 = smov 0   ;;  %s1887_s27 = smov 0  }
   0x4 LB: > { %s1902_s28 = sadd.s32 4294967295, %s1833_s27   ;;  %s1348_s29 = sadd.s32 4294967294, %s1833_s27   ;;  %s1833_s27 = sphi %s1887_s27, %s2186_s27   ;;  %s1829_s26 = sphi %s1885_s26, %s2185_s26   ;;  %s1825_s25 = sphi %s1883_s25, %s2184_s25   ;;  %s1821_s24 = sphi %s1881_s24, %s2183_s24  }
   0x5   : > { %s1906_s30 = sadd.s32 1, %s1833_s27   ;;  %s180_s8 = sadd.s32 1, %s1829_s26 }
   0x6   : > { %s177_s9 = ssub.s32 %s1833_s27, %s1906_s30  ;;  %p190_p0 = scmp.ne.s32.totalorder %s1829_s26, %s1825_s25 }
   0x7   : > { %p178_p1 = scmp.eq.s32.totalorder %s177_s9, 0  ;;  %p191_p2 = scmp.eq.s32.totalorder %s1902_s28, 1 }
   0x8   : > { %p196_p3 = scmp.ne.s32.totalorder %s1825_s25, %s1821_s24  ;;  %p197_p4 = scmp.eq.s32.totalorder %s1348_s29, 1 }
   0x9   : > { %s1917_s10 = scalar_select %p178_p1, %s1829_s26, %s180_s8  }
   0xa   : > { %p1919_p5 = por %p191_p2, %p190_p0  ;;  %p1923_p6 = por %p197_p4, %p196_p3 }
   0xb   : > { %p1349_p7 = scmp.ge.s32.totalorder %s1833_s27, 1  ;;  %p204_p8 = scmp.lt.s32.totalorder %s1833_s27, 3 }
   0xc   : > { %s2174_s11 = scalar_select %p1919_p5, 1, 0 }
   0xd   : > { %s2175_s12 = scalar_select %p1923_p6, 1, 0 }
   0xe   : > { %p2171_p9 = scmp.eq.s32.totalorder %s1902_s28, 0  ;;  %p1930_p10 = pnand %p1349_p7, %p204_p8 }
   0xf   : > { %s1835_s14 = smov [#allocation2]   ;;  %s1739_s19 = scalar_lea.hbm %s2166_s3, 4608 }
  0x10   : > { %s2176_s13 = scalar_select %p1930_p10, 1, 0 }
  0x11   : > { %s222_s15 = sshll.u32 %s1835_s14, 4  ;;  %p1640_p11 = pneg %p1930_p10  ;;  %s223_s15 = int_to_ptr.vmem [resolvable:$true] %s222_s15 }
  0x12   : > { %p1740_p13 = scmp.ne.s32.totalorder %s2166_s3, %s1739_s19  ;;  %p1746_p3 = scmp.lt.u32.totalorder %s1739_s19, %s2166_s3 }
  0x13   : > { %p1938_p12 = pnand %p2171_p9, %p1640_p11 }
  0x15   : > { %p1741_p0 = pneg %p1938_p12 }
  0x17   : > { %p1742_p1 = pnand %p1741_p0, %p1740_p13 }
  0x19   : > { %p1743_p2 = pneg %p1742_p1 }
  0x1b   : > { %p1748_p4 = pnand %p1746_p3, %p1743_p2 }
  0x1d   : > { %1751 = shalt.err (!%p1748_p4)
}
  0x1e   : > { %s1752_s29 = scalar_lea.vmem %s223_s15, 4608  ;;  %p1760_p9 = scmp.lt.s32.totalorder %s223_s15, %s223_s15 }
  0x1f   : > { %p1753_p7 = scmp.ne.s32.totalorder %s223_s15, %s1752_s29  ;;  %p1761_p6 = scmp.lt.s32.totalorder %s1752_s29, %s1752_s29 }
  0x21   : > { %p1755_p8 = pnand %p1753_p7, %p1741_p0  ;;  %p1762_p5 = por %p1761_p6, %p1760_p9 }
  0x23   : > { %p1756_p11 = pneg %p1755_p8 }
  0x25   : > { %p1763_p10 = pnand %p1762_p5, %p1756_p11 }
  0x27   : > { %1766 = shalt.err (!%p1763_p10)
}
  0x28   : > { %s1836_s8 = smov 64   ;;  %s1837_s9 = smov 4  }
  0x29   : > { %1643 = dma.hbm_to_vmem [thread:$0]  (!%p1938_p12), %s2166_s3, 4608, %s223_s15, [#allocation3], %s1836_s8, %s1836_s8, %s1837_s9  }
  0x2a   : > { %p2178_p13 = scmp.ne.s32.totalorder %s2176_s13, 0 }
  0x2b   : > { %p2179_p1 = scmp.eq.s32.totalorder (!%p2178_p13), %s1902_s28, 0 }
  0x2c   : > { %254 = sbr.rel (%p2178_p13) target bundleno = 2516 (0x9d4), region = 48 }
  0x33   : > { %1812 = dma.done.wait (%p2179_p1), [#allocation3], 4608   ;;  %p2180_p0 = pmov %p2179_p1 }
  0x34   : > { %v1838_v0 = vmov 0.0   ;;  %vm1839_vm0 = vmmov 0   ;;  %v1688_v1 = vld [vmem:[%s2164_s1] sm:$0xff]   ;;  %p285_p5 = scmp.lt.s32.totalorder %s1902_s28, 1  ;;  %v1689_v2 = vld [vmem:[%s2164_s1 + $0x8] sm:$0xff]   ;;  %vm355_vm1 = vcmask 1041408  }
  0x35   : > { %1814 = vsyncadd (%p2180_p0), [#allocation3], 4294962688  ;;  %1496 = vmatprep.subr.bf16.mxu0 %v1838_v0  ;;  %1510 = vmatprep.mubr.msk.bf16.mxu0 %vm1839_vm0, %v1838_v0  ;;  %v1690_v3 = vld [vmem:[%s2164_s1 + $0x10] sm:$0xff]   ;;  %v1695_v5 = vld [vmem:[#allocation2] sm:$0xff]   ;;  %vm351_vm2 = vcmask 818176   ;;  %vm440_vm3 = vcmask 523264  }
  0x36   : > { %1514 = vmatprep.subr.bf16.mxu1 %v1838_v0  ;;  %1522 = vmatprep.mubr.msk.bf16.mxu1 %vm1839_vm0, %v1838_v0  ;;  %s286_s19 = scalar_select %p285_p5, %s1902_s28, 1  ;;  %v1694_v4 = vld [vmem:[%s2164_s1 + $0x30] ss:$0 sps:$4 sm:$0x33]   ;;  %v1691_v6 = vld [vmem:[%s2164_s1 + $0x18] sm:$0xff]   ;;  %v1696_v8 = vld [vmem:[#allocation2 + $0x8] sm:$0xff]  }
  0x37   : > { %1497 = vmatpush3.bf16.msra.mxu0 %v1688_v1  ;;  %v357_v7 = vsel %vm355_vm1, %v1694_v4, 0  ;;  %1515 = vmatpush3.bf16.msra.mxu1 %v1695_v5  ;;  %v1692_v9 = vld [vmem:[%s2164_s1 + $0x20] sm:$0xff]   ;;  %v1693_v10 = vld [vmem:[%s2164_s1 + $0x28] sm:$0xff]   ;;  %v1697_v13 = vld [vmem:[#allocation2 + $0x10] sm:$0xff]   ;;  %s282_s22 = sand.u32 1, %s1825_s25   ;;  %s1435_s29 = sshll.u32 %s1902_s28, 7 }
  0x38   : > { %1498 = vmatprep.subr.bf16.mxu0 %v1838_v0  ;;  %s1355_s9 = sshll.u32 %s286_s19, 3  ;;  %1516 = vmatprep.subr.bf16.mxu1 %v1838_v0  ;;  %v1698_v14 = vld [vmem:[#allocation2 + $0x18] sm:$0xff]   ;;  %v1356_v15 = vld [vmem:[%s2165_s2] ss:$0 sm:$0xff]  ;;  %v1700_v24 = vld [vmem:[#allocation2 + $0x28] sm:$0xff]   ;;  %s1354_s23 = sshll.u32 %s282_s22, 3 }
  0x39   : > { %s288_s19 = scalar_lea.vmem %s2163_s0, %s1355_s9  ;;  %v1699_v22 = vld [vmem:[#allocation2 + $0x20] sm:$0xff]   ;;  %v1701_v25 = vld [vmem:[#allocation2 + $0x30] sm:$0xff]   ;;  %v1702_v26 = vld [vmem:[#allocation2 + $0x38] sm:$0xff]   ;;  %s284_s8 = scalar_lea.vmem [#allocation5], %s1354_s23 }
  0x3a   : > { %v290_v11 = vld [vmem:[%s288_s19] sm:$0xff]  ;;  %v1704_v28 = vld [vmem:[#allocation2 + $0x48] sm:$0xff]   ;;  %v1705_v37 = vld [vmem:[#allocation2 + $0x50] sm:$0xff]   ;;  %s1277_s9 = sshll.u32 %s284_s8, 4  ;;  %s2120_s13 = scalar_lea.hbm %s2170_s7, %s1435_s29  ;;  %s2122_s9 = int_to_ptr.vmem [resolvable:$true] %s1277_s9 }
  0x3b   : > { %1499 = vmatpush3.bf16.msra.mxu0 %v1689_v2  ;;  %1517 = vmatpush3.bf16.msra.mxu1 %v1696_v8  ;;  %v291_v12 = vpack.c.bf16 %v290_v11, %v290_v11  ;;  %v1703_v27 = vld [vmem:[#allocation2 + $0x40] sm:$0xff]   ;;  %v1706_v38 = vld [vmem:[#allocation2 + $0x58] sm:$0xff]   ;;  %v1708_v40 = vld [vmem:[#allocation2 + $0x68] sm:$0xff]   ;;  %s1264_s15 = scalar_lea.sflag [#allocation4], %s282_s22  ;;  %s1767_s16 = scalar_lea.vmem %s2122_s9, 128 }
  0x3c   : > { %1500 = vmatprep.subr.bf16.mxu0 %v1838_v0  ;;  %1518 = vmatprep.subr.bf16.mxu1 %v1838_v0  ;;  %v1365_v29 = vld [vmem:[%s2167_s4] ss:$0 sm:$0xff]  ;;  %v1372_v41 = vld [vmem:[%s2167_s4 + $0x1] ss:$0 sm:$0xff]  ;;  %v1709_v49 = vld [vmem:[#allocation2 + $0x70] sm:$0xff]   ;;  %p1768_p6 = scmp.ne.s32.totalorder %s2122_s9, %s1767_s16  ;;  %p2181_p9 = scmp.ne.s32.totalorder %s2174_s11, 0 }
  0x3d   : > { %v1707_v39 = vld [vmem:[#allocation2 + $0x60] sm:$0xff]   ;;  %v1710_v50 = vld [vmem:[#allocation2 + $0x78] sm:$0xff]   ;;  %v1712_v52 = vld [vmem:[#allocation2 + $0x88] sm:$0xff]   ;;  %s1840_s28 = smov [#allocation5]  }
  0x3e   : > { %v1711_v51 = vld [vmem:[#allocation2 + $0x80] sm:$0xff]   ;;  %v1713_v61 = vld [vmem:[#allocation2 + $0x90] sm:$0xff]   ;;  %v1714_v62 = vld [vmem:[#allocation2 + $0x98] sm:$0xff]   ;;  %p1769_p10 = pnand %p1768_p6, %p2181_p9  ;;  %s1771_s18 = sshll.u32 %s1840_s28, 4  ;;  %s1772_s18 = int_to_ptr.vmem [resolvable:$false] %s1771_s18 }
  0x3f   : > { %1501 = vmatpush3.bf16.msra.mxu0 %v1690_v3  ;;  %1519 = vmatpush3.bf16.msra.mxu1 %v1697_v13  ;;  %v1379_v53 = vld [vmem:[%s2167_s4 + $0x2] ss:$0 sm:$0xff]  ;;  %v1716_v1 = vld [vmem:[#allocation2 + $0xa8] sm:$0xff]   ;;  %v1386_v2 = vld [vmem:[%s2167_s4 + $0x3] ss:$0 sm:$0xff]  ;;  %s1773_s19 = scalar_lea.vmem %s1772_s18, 256  ;;  %p1774_p2 = scmp.lt.s32.totalorder %s2122_s9, %s1772_s18 }
  0x40   : > { %1502 = vmatprep.subr.bf16.mxu0 %v1838_v0  ;;  %1520 = vmatprep.subr.bf16.mxu1 %v1838_v0  ;;  %v1715_v63 = vld [vmem:[#allocation2 + $0xa0] sm:$0xff]   ;;  %v1718_v11 = vld [vmem:[#allocation2 + $0xb8] sm:$0xff]   ;;  %v1720_v13 = vld [vmem:[#allocation2 + $0xc8] sm:$0xff]   ;;  %p1770_p12 = pneg %p1769_p10  ;;  %p1775_p3 = scmp.lt.s32.totalorder %s1773_s19, %s1767_s16 }
  0x42   : > { %p1776_p4 = por %p1775_p3, %p1774_p2 }
  0x43   : > { %1503 = vmatpush3.bf16.msra.mxu0 %v1691_v6  ;;  %1521 = vmatpush3.bf16.msra.mxu1 %v1698_v14  ;;  %v1393_v14 = vld [vmem:[%s2167_s4 + $0x4] ss:$0 sm:$0xff] }
  0x44   : > { %1504 = vmatprep.subr.bf16.mxu0 %v1838_v0  ;;  %1526 = vmatprep.subr.bf16.mxu1 %v1838_v0  ;;  %p1777_p7 = pnand %p1776_p4, %p1770_p12 }
  0x47   : > { %1505 = vmatpush3.bf16.msra.mxu0 %v1692_v9 }
  0x48   : > { %1506 = vmatprep.subr.bf16.mxu0 %v1838_v0 }
  0x4b   : > { %1507 = vmatpush3.bf16.msra.mxu0 %v1693_v10  ;;  %v1717_v10 = vld [vmem:[#allocation2 + $0xb0] sm:$0xff]  }
  0x4c   : > { %1508 = vmatprep.subr.bf16.mxu0 %v1838_v0 }
  0x4f   : > { %1509 = vmatpush3.bf16.msra.mxu0 %v357_v7 }
  0x50   : > { %1538 = vmatprep.subr.bf16.mxu0 %v1838_v0 }
  0x52   : > { %1511 = vmatmul.mubr.msk.bf16.vlgmr.msra.gmra.mrb[0].mxu0 %vm351_vm2, %v291_v12  ;;  %v1719_v12 = vld [vmem:[#allocation2 + $0xc0] sm:$0xff]  }
  0x53   : > { %1546 = vmatprep.mubr.msk.bf16.mxu0 %vm1839_vm0, %v1838_v0  ;;  %1539 = vmatpush3.bf16.msra.mxu0 %v1703_v27 }
  0x54   : > { %1540 = vmatprep.subr.bf16.mxu0 %v1838_v0 }
  0x57   : > { %1541 = vmatpush3.bf16.msra.mxu0 %v1704_v28 }
  0x58   : > { %1542 = vmatprep.subr.bf16.mxu0 %v1838_v0 }
  0x5b   : > { %1543 = vmatpush3.bf16.msra.mxu0 %v1705_v37  ;;  %v1728_v37 = vld [vmem:[#allocation2 + $0x108] sm:$0xff]  }
  0x5c   : > { %1544 = vmatprep.subr.bf16.mxu0 %v1838_v0 }
  0x5f   : > { %1545 = vmatpush3.bf16.msra.mxu0 %v1706_v38  ;;  %v1407_v38 = vld [vmem:[%s2167_s4 + $0x6] ss:$0 sm:$0xff] }
  0x60   : > { %1562 = vmatprep.subr.bf16.mxu0 %v1838_v0 }
 0x125   : > { %v393_v16 = vpop.f32.mrb[0].mxu0 }
 0x126   : > { %v394_v17 = vadd.f32 %v1356_v15, %v393_v16  ;;  %v1512_v18 = vpop.f32.mrb[1].mxu0 }
 0x127   : > { %v396_v19 = vpop.f32.mrb[2].mxu0 }
 0x128   : > { %v399_v20 = vmax.f32 %v394_v17, 0.0  ;;  %v1513_v21 = vpop.f32.mrb[3].mxu0 }
 0x12a   : > { %v400_v23 = vpack.c.bf16 %v399_v20, %v399_v20 }
 0x12c   : > { %1523 = vmatmul.mubr.msk.bf16.vlgmr.msra.gmra.mrb[0].mxu1 %vm440_vm3, %v400_v23  ;;  %v1722_v23 = vld [vmem:[#allocation2 + $0xd8] sm:$0xff]  }
 0x12d   : > { %1527 = vmatpush3.bf16.msra.mxu1 %v1699_v22  ;;  %1534 = vmatprep.mubr.msk.bf16.mxu1 %vm1839_vm0, %v1838_v0  ;;  %v1721_v22 = vld [vmem:[#allocation2 + $0xd0] sm:$0xff]  }
 0x12e   : > { %1528 = vmatprep.subr.bf16.mxu1 %v1838_v0 }
 0x131   : > { %1529 = vmatpush3.bf16.msra.mxu1 %v1700_v24  ;;  %v1723_v24 = vld [vmem:[#allocation2 + $0xe0] sm:$0xff]  }
 0x132   : > { %1530 = vmatprep.subr.bf16.mxu1 %v1838_v0 }
 0x135   : > { %1531 = vmatpush3.bf16.msra.mxu1 %v1701_v25  ;;  %v1724_v25 = vld [vmem:[#allocation2 + $0xe8] sm:$0xff]  }
 0x136   : > { %1532 = vmatprep.subr.bf16.mxu1 %v1838_v0 }
 0x139   : > { %1533 = vmatpush3.bf16.msra.mxu1 %v1702_v26  ;;  %v1400_v26 = vld [vmem:[%s2167_s4 + $0x5] ss:$0 sm:$0xff] }
 0x13a   : > { %1550 = vmatprep.subr.bf16.mxu1 %v1838_v0 }
 0x1ff   : > { %v478_v30 = vpop.f32.mrb[0].mxu1 }
 0x200   : > { %v479_v31 = vadd.f32 %v1365_v29, %v478_v30  ;;  %v1524_v32 = vpop.f32.mrb[1].mxu1 }
 0x201   : > { %v481_v33 = vpop.f32.mrb[2].mxu1 }
 0x202   : > { %v484_v34 = vmax.f32 %v479_v31, 0.0  ;;  %v1525_v35 = vpop.f32.mrb[3].mxu1 }
 0x203   : > { %v1726_v35 = vld [vmem:[#allocation2 + $0xf8] sm:$0xff]  }
 0x204   : > { %v485_v36 = vpack.c.bf16 %v484_v34, %v484_v34  ;;  %v1725_v34 = vld [vmem:[#allocation2 + $0xf0] sm:$0xff]  }
 0x206   : > { %1535 = vmatmul.mubr.msk.bf16.vlgmr.msra.gmra.mrb[4].mxu1 %vm440_vm3, %v485_v36  ;;  %v1727_v36 = vld [vmem:[#allocation2 + $0x100] sm:$0xff]  }
 0x207   : > { %1558 = vmatprep.mubr.msk.bf16.mxu1 %vm1839_vm0, %v1838_v0  ;;  %1551 = vmatpush3.bf16.msra.mxu1 %v1707_v39 }
 0x208   : > { %1552 = vmatprep.subr.bf16.mxu1 %v1838_v0 }
 0x20b   : > { %1553 = vmatpush3.bf16.msra.mxu1 %v1708_v40 }
 0x20c   : > { %1554 = vmatprep.subr.bf16.mxu1 %v1838_v0 }
 0x20f   : > { %1555 = vmatpush3.bf16.msra.mxu1 %v1709_v49  ;;  %v1732_v49 = vld [vmem:[%s2168_s5 + $0x8] sm:$0xff]  }
 0x210   : > { %1556 = vmatprep.subr.bf16.mxu1 %v1838_v0 }
 0x213   : > { %1557 = vmatpush3.bf16.msra.mxu1 %v1710_v50  ;;  %v1414_v50 = vld [vmem:[%s2167_s4 + $0x7] ss:$0 sm:$0xff] }
 0x214   : > { %1574 = vmatprep.subr.bf16.mxu1 %v1838_v0 }
 0x2d9   : > { %v564_v42 = vpop.f32.mrb[4].mxu1 }
 0x2da   : > { %v565_v43 = vadd.f32 %v1372_v41, %v564_v42  ;;  %v1536_v44 = vpop.f32.mrb[5].mxu1 }
 0x2db   : > { %v567_v45 = vpop.f32.mrb[6].mxu1 }
 0x2dc   : > { %v570_v46 = vmax.f32 %v565_v43, 0.0  ;;  %v1537_v47 = vpop.f32.mrb[7].mxu1 }
 0x2dd   : > { %v1730_v47 = vld [vmem:[#allocation2 + $0x118] sm:$0xff]  }
 0x2de   : > { %v571_v48 = vpack.c.bf16 %v570_v46, %v570_v46  ;;  %v1729_v46 = vld [vmem:[#allocation2 + $0x110] sm:$0xff]  }
 0x2e0   : > { %1547 = vmatmul.mubr.msk.bf16.vlgmr.msra.gmra.mrb[4].mxu0 %vm440_vm3, %v571_v48  ;;  %v1731_v48 = vld [vmem:[%s2168_s5] sm:$0xff]  }
 0x2e1   : > { %1570 = vmatprep.mubr.msk.bf16.mxu0 %vm1839_vm0, %v1838_v0  ;;  %1563 = vmatpush3.bf16.msra.mxu0 %v1711_v51 }
 0x2e2   : > { %1564 = vmatprep.subr.bf16.mxu0 %v1838_v0 }
 0x2e5   : > { %1565 = vmatpush3.bf16.msra.mxu0 %v1712_v52 }
 0x2e6   : > { %1566 = vmatprep.subr.bf16.mxu0 %v1838_v0 }
 0x2e9   : > { %1567 = vmatpush3.bf16.msra.mxu0 %v1713_v61 }
 0x2ea   : > { %1568 = vmatprep.subr.bf16.mxu0 %v1838_v0 }
 0x2ed   : > { %1569 = vmatpush3.bf16.msra.mxu0 %v1714_v62 }
 0x2ee   : > { %1586 = vmatprep.subr.bf16.mxu0 %v1838_v0 }
 0x3b3   : > { %v650_v54 = vpop.f32.mrb[4].mxu0 }
 0x3b4   : > { %v651_v55 = vadd.f32 %v1379_v53, %v650_v54  ;;  %v1548_v56 = vpop.f32.mrb[5].mxu0 }
 0x3b5   : > { %v653_v57 = vpop.f32.mrb[6].mxu0 }
 0x3b6   : > { %v656_v58 = vmax.f32 %v651_v55, 0.0  ;;  %v1549_v59 = vpop.f32.mrb[7].mxu0 }
 0x3b7   : > { %v1734_v59 = vld [vmem:[%s2168_s5 + $0x18] sm:$0xff]  }
 0x3b8   : > { %v657_v60 = vpack.c.bf16 %v656_v58, %v656_v58  ;;  %v1733_v58 = vld [vmem:[%s2168_s5 + $0x10] sm:$0xff]  }
 0x3ba   : > { %1559 = vmatmul.mubr.msk.bf16.vlgmr.msra.gmra.mrb[8].mxu1 %vm440_vm3, %v657_v60  ;;  %v1421_v60 = vld [vmem:[%s2167_s4 + $0x8] ss:$0 sm:$0xff] }
 0x3bb   : > { %1582 = vmatprep.mubr.msk.bf16.mxu1 %vm1839_vm0, %v1838_v0  ;;  %1575 = vmatpush3.bf16.msra.mxu1 %v1715_v63 }
 0x3bc   : > { %1576 = vmatprep.subr.bf16.mxu1 %v1838_v0 }
 0x3bf   : > { %1577 = vmatpush3.bf16.msra.mxu1 %v1716_v1 }
 0x3c0   : > { %1578 = vmatprep.subr.bf16.mxu1 %v1838_v0 }
 0x3c3   : > { %1579 = vmatpush3.bf16.msra.mxu1 %v1717_v10 }
 0x3c4   : > { %1580 = vmatprep.subr.bf16.mxu1 %v1838_v0 }
 0x3c7   : > { %1581 = vmatpush3.bf16.msra.mxu1 %v1718_v11 }
 0x3c8   : > { %1598 = vmatprep.subr.bf16.mxu1 %v1838_v0 }
 0x48d   : > { %v736_v3 = vpop.f32.mrb[8].mxu1 }
 0x48e   : > { %v737_v4 = vadd.f32 %v1386_v2, %v736_v3  ;;  %v1560_v5 = vpop.f32.mrb[9].mxu1 }
 0x48f   : > { %v739_v6 = vpop.f32.mrb[10].mxu1 }
 0x490   : > { %v742_v7 = vmax.f32 %v737_v4, 0.0  ;;  %v1561_v8 = vpop.f32.mrb[11].mxu1 }
 0x492   : > { %v743_v9 = vpack.c.bf16 %v742_v7, %v742_v7 }
 0x494   : > { %1571 = vmatmul.mubr.msk.bf16.vlgmr.msra.gmra.mrb[8].mxu0 %vm440_vm3, %v743_v9 }
 0x495   : > { %1594 = vmatprep.mubr.msk.bf16.mxu0 %vm1839_vm0, %v1838_v0  ;;  %1587 = vmatpush3.bf16.msra.mxu0 %v1719_v12 }
 0x496   : > { %1588 = vmatprep.subr.bf16.mxu0 %v1838_v0 }
 0x499   : > { %1589 = vmatpush3.bf16.msra.mxu0 %v1720_v13 }
 0x49a   : > { %1590 = vmatprep.subr.bf16.mxu0 %v1838_v0 }
 0x49d   : > { %1591 = vmatpush3.bf16.msra.mxu0 %v1721_v22 }
 0x49e   : > { %1592 = vmatprep.subr.bf16.mxu0 %v1838_v0 }
 0x4a1   : > { %1593 = vmatpush3.bf16.msra.mxu0 %v1722_v23 }
 0x4a2   : > { %1610 = vmatprep.subr.bf16.mxu0 %v1838_v0 }
 0x567   : > { %v822_v15 = vpop.f32.mrb[8].mxu0 }
 0x568   : > { %v823_v16 = vadd.f32 %v1393_v14, %v822_v15  ;;  %v1572_v17 = vpop.f32.mrb[9].mxu0 }
 0x569   : > { %v825_v18 = vpop.f32.mrb[10].mxu0 }
 0x56a   : > { %v828_v19 = vmax.f32 %v823_v16, 0.0  ;;  %v1573_v20 = vpop.f32.mrb[11].mxu0 }
 0x56c   : > { %v829_v21 = vpack.c.bf16 %v828_v19, %v828_v19 }
 0x56e   : > { %1583 = vmatmul.mubr.msk.bf16.vlgmr.msra.gmra.mrb[12].mxu1 %vm440_vm3, %v829_v21 }
 0x56f   : > { %1606 = vmatprep.mubr.msk.bf16.mxu1 %vm1839_vm0, %v1838_v0  ;;  %1599 = vmatpush3.bf16.msra.mxu1 %v1723_v24 }
 0x570   : > { %1600 = vmatprep.subr.bf16.mxu1 %v1838_v0 }
 0x573   : > { %1601 = vmatpush3.bf16.msra.mxu1 %v1724_v25 }
 0x574   : > { %1602 = vmatprep.subr.bf16.mxu1 %v1838_v0 }
 0x577   : > { %1603 = vmatpush3.bf16.msra.mxu1 %v1725_v34 }
 0x578   : > { %1604 = vmatprep.subr.bf16.mxu1 %v1838_v0 }
 0x57b   : > { %1605 = vmatpush3.bf16.msra.mxu1 %v1726_v35 }
 0x57c   : > { %1622 = vmatprep.subr.bf16.mxu1 %v1838_v0 }
 0x641   : > { %v908_v27 = vpop.f32.mrb[12].mxu1 }
 0x642   : > { %v909_v28 = vadd.f32 %v1400_v26, %v908_v27  ;;  %v1584_v29 = vpop.f32.mrb[13].mxu1 }
 0x643   : > { %v911_v30 = vpop.f32.mrb[14].mxu1 }
 0x644   : > { %v914_v31 = vmax.f32 %v909_v28, 0.0  ;;  %v1585_v32 = vpop.f32.mrb[15].mxu1 }
 0x646   : > { %v915_v33 = vpack.c.bf16 %v914_v31, %v914_v31 }
 0x648   : > { %1595 = vmatmul.mubr.msk.bf16.vlgmr.msra.gmra.mrb[12].mxu0 %vm440_vm3, %v915_v33 }
 0x649   : > { %1618 = vmatprep.mubr.msk.bf16.mxu0 %vm1839_vm0, %v1838_v0  ;;  %1611 = vmatpush3.bf16.msra.mxu0 %v1727_v36 }
 0x64a   : > { %1612 = vmatprep.subr.bf16.mxu0 %v1838_v0 }
 0x64d   : > { %1613 = vmatpush3.bf16.msra.mxu0 %v1728_v37 }
 0x64e   : > { %1614 = vmatprep.subr.bf16.mxu0 %v1838_v0 }
 0x651   : > { %1615 = vmatpush3.bf16.msra.mxu0 %v1729_v46 }
 0x652   : > { %1616 = vmatprep.subr.bf16.mxu0 %v1838_v0 }
 0x655   : > { %1617 = vmatpush3.bf16.msra.mxu0 %v1730_v47 }
 0x71b   : > { %v994_v39 = vpop.f32.mrb[12].mxu0 }
 0x71c   : > { %v995_v40 = vadd.f32 %v1407_v38, %v994_v39  ;;  %v1596_v41 = vpop.f32.mrb[13].mxu0 }
 0x71d   : > { %v997_v42 = vpop.f32.mrb[14].mxu0 }
 0x71e   : > { %v1000_v43 = vmax.f32 %v995_v40, 0.0  ;;  %v1597_v44 = vpop.f32.mrb[15].mxu0 }
 0x720   : > { %v1001_v45 = vpack.c.bf16 %v1000_v43, %v1000_v43 }
 0x722   : > { %1607 = vmatmul.mubr.msk.bf16.vlgmr.msra.gmra.mrb[16].mxu1 %vm440_vm3, %v1001_v45 }
 0x723   : > { %1630 = vmatprep.mubr.msk.bf16.mxu1 %vm1839_vm0, %v1838_v0  ;;  %1623 = vmatpush3.bf16.msra.mxu1 %v1731_v48 }
 0x724   : > { %1624 = vmatprep.subr.bf16.mxu1 %v1838_v0 }
 0x727   : > { %1625 = vmatpush3.bf16.msra.mxu1 %v1732_v49 }
 0x728   : > { %1626 = vmatprep.subr.bf16.mxu1 %v1838_v0 }
 0x72b   : > { %1627 = vmatpush3.bf16.msra.mxu1 %v1733_v58 }
 0x72c   : > { %1628 = vmatprep.subr.bf16.mxu1 %v1838_v0  ;;  %v1427_v0 = vld [vmem:[%s2169_s6] ss:$0 sm:$0xff] }
 0x72f   : > { %1629 = vmatpush3.bf16.msra.mxu1 %v1734_v59 }
 0x7f5   : > { %v1080_v51 = vpop.f32.mrb[16].mxu1 }
 0x7f6   : > { %v1081_v52 = vadd.f32 %v1414_v50, %v1080_v51  ;;  %v1608_v53 = vpop.f32.mrb[17].mxu1 }
 0x7f7   : > { %v1083_v54 = vpop.f32.mrb[18].mxu1 }
 0x7f8   : > { %v1086_v55 = vmax.f32 %v1081_v52, 0.0  ;;  %v1609_v56 = vpop.f32.mrb[19].mxu1 }
 0x7fa   : > { %v1087_v57 = vpack.c.bf16 %v1086_v55, %v1086_v55 }
 0x7fc   : > { %1619 = vmatmul.mubr.msk.bf16.vlgmr.msra.gmra.mrb[16].mxu0 %vm440_vm3, %v1087_v57 }
 0x8cf   : > { %v1166_v61 = vpop.f32.mrb[16].mxu0 }
 0x8d0   : > { %v1167_v62 = vadd.f32 %v1421_v60, %v1166_v61  ;;  %v1620_v63 = vpop.f32.mrb[17].mxu0 }
 0x8d1   : > { %v1169_v1 = vpop.f32.mrb[18].mxu0 }
 0x8d2   : > { %v1172_v2 = vmax.f32 %v1167_v62, 0.0  ;;  %v1621_v3 = vpop.f32.mrb[19].mxu0 }
 0x8d4   : > { %v1173_v4 = vpack.c.bf16 %v1172_v2, %v1172_v2 }
 0x8d6   : > { %1631 = vmatmul.mubr.msk.bf16.vlgmr.msra.gmra.mrb[20].mxu1 %vm440_vm3, %v1173_v4 }
 0x9a9   : > { %v1250_v5 = vpop.f32.mrb[20].mxu1 }
 0x9aa   : > { %v1251_v6 = vadd.f32 %v1427_v0, %v1250_v5  ;;  %v1632_v7 = vpop.f32.mrb[21].mxu1 }
 0x9ab   : > { %v1253_v8 = vpop.f32.mrb[22].mxu1 }
 0x9ac   : > { %v1433_v9 = vmul.f32 -1.442695, %v1251_v6  ;;  %v1633_v10 = vpop.f32.mrb[23].mxu1 }
 0x9ae   : > { %1735 = vpow2.f32 %v1433_v9 }
 0x9b8   : > { %v1736_v11 = vpop.eup %1735 }
 0x9b9   : > { %v1259_v12 = vadd.f32 1.0, %v1736_v11 }
 0x9bb   : > { %1737 = vrcp.f32 %v1259_v12 }
 0x9c5   : > { %v1738_v13 = vpop.eup %1737 }
 0x9c6   : > { %1262 = vst.msk [vmem:[%s284_s8] sm:$0xff] %vm351_vm2, %v1738_v13 }
 0x9c7   : > { %1780 = shalt.err (!%p1777_p7)
}
 0x9c8   : > { %s1781_s20 = scalar_lea.hbm %s2120_s13, 128  ;;  %s1785_s23 = scalar_lea.hbm %s2170_s7, 256 }
 0x9c9   : > { %p1782_p8 = scmp.ne.s32.totalorder %s2120_s13, %s1781_s20  ;;  %p1786_p1 = scmp.lt.u32.totalorder %s2120_s13, %s2170_s7 }
 0x9ca   : > { %p1787_p0 = scmp.lt.u32.totalorder %s1785_s23, %s1781_s20  ;;  %p1789_p6 = scmp.lt.u32.totalorder %s1781_s20, %s2120_s13 }
 0x9cb   : > { %p1783_p11 = pnand %p1782_p8, %p2181_p9 }
 0x9cc   : > { %p1788_p5 = por %p1787_p0, %p1786_p1 }
 0x9cd   : > { %p1784_p13 = pneg %p1783_p11 }
 0x9ce   : > { %p1790_p10 = por %p1789_p6, %p1788_p5 }
 0x9d0   : > { %p1791_p12 = pnand %p1790_p10, %p1784_p13 }
 0x9d2   : > { %1794 = shalt.err (!%p1791_p12)
}
 0x9d3   : > { %1638 = dma.vmem_to_hbm [thread:$0]  (%p2181_p9), %s2122_s9, 128, %s2120_s13, %s1264_s15  }
 0x9d4 PF: > { %p1650_p2 = scmp.ge.s32.totalorder %s1833_s27, 2  ;;  %s1289_s14 = sand.u32 1, %s1821_s24  }
 0x9d5   : > { %p2182_p3 = scmp.ne.s32.totalorder %s2175_s12, 0  ;;  %s1290_s17 = scalar_lea.sflag [#allocation4], %s1289_s14 }
 0x9d7   : > { %p1645_p4 = pnand %p1650_p2, %p2182_p3 }
 0x9d9   : > { %1816 = dma.done.wait (!%p1645_p4), %s1290_s17, 128  }
 0x9da   : > { %1818 = vsyncadd (!%p1645_p4), %s1290_s17, 4294967168  ;;  %p18_p7 = scmp.ge.s32.totalorder %s1906_s30, 4   ;;  %s2183_s24 = smov %s1825_s25 }
 0x9db   : > { %s2184_s25 = smov %s1829_s26  ;;  %s2185_s26 = smov %s1917_s10 }
 0x9dc   : > { %s2186_s27 = smov %s1906_s30  ;;  %20 = sbr.rel (!%p18_p7) target bundleno = 4 (0x4), region = 104 }
 0x9e3   :  { %1295 = vsyncpa [#allocation3], 1 }
 0x9e4   :  { %1297 = vsyncpa [#allocation3 + $0x1], 1 }
 0x9e5   :  { %1298 = vsyncpa [#allocation4], 1 }
 0x9e6   :  { %1300 = vsyncpa [#allocation4 + $0x1], 1 }

</bundles_post_ra>
